<compile_context>
chip_gen: v6e
topology: v6e:2x2x1
jax: 0.10.0
libtpu: 0.0.40
codegen_flags: <defaults>
</compile_context>

<pallas_src>
import math

import jax
import jax.numpy as jnp
from jax.experimental import pallas as pl
from jax.experimental.pallas import tpu as pltpu

_INV_SQRT2 = 1.0 / math.sqrt(2.0)


def _gelu_kernel(x_ref, o_ref):
    xf = x_ref[...].astype(jnp.float32)
    cdf = 0.5 * (1.0 + jax.lax.erf(xf * _INV_SQRT2))
    o_ref[...] = (cdf * xf).astype(o_ref.dtype)


_COL_CANDIDATES = (4096, 2048, 1024, 512, 256, 128)


def _choose_cols(n):
    """Pick a lane-dense column width (multiple of 128) that divides n."""
    # Prefer widths that also leave >= 8 rows (full sublane utilization).
    for c in _COL_CANDIDATES:
        if n % c == 0 and n // c >= 8:
            return c
    for c in _COL_CANDIDATES:
        if n % c == 0:
            return c
    return None


def _gelu_2d(x2):
    rows, cols = x2.shape
    itemsize = jnp.dtype(x2.dtype).itemsize

    # Byte-budgeted row tile: ~4 MiB per input block, multiple of 8 rows.
    target_block_bytes = 4 << 20
    rt = max(8, (target_block_bytes // (cols * itemsize)) // 8 * 8)
    if rt >= rows:
        rt = rows  # full-extent block is always legal, even if rows % 8 != 0
    grid = (pl.cdiv(rows, rt),)

    block_bytes = rt * cols * itemsize
    # in + out, double-buffered, plus headroom; stays well under 64 MiB (v7x).
    vmem_limit = int(min(max(4 * block_bytes + (4 << 20), 32 << 20), 56 << 20))

    return pl.pallas_call(
        _gelu_kernel,
        out_shape=jax.ShapeDtypeStruct((rows, cols), x2.dtype),
        grid_spec=pltpu.PrefetchScalarGridSpec(
            num_scalar_prefetch=0,
            grid=grid,
            in_specs=[pl.BlockSpec((rt, cols), lambda i: (i, 0))],
            out_specs=pl.BlockSpec((rt, cols), lambda i: (i, 0)),
        ),
        compiler_params=pltpu.CompilerParams(
            dimension_semantics=("parallel",),
            vmem_limit_bytes=vmem_limit,
        ),
    )(x2)


def gelu(x):
    """Exact GELU: x * Phi(x). Works on any shape; elementwise."""
    orig_shape = x.shape
    n = x.size
    if n == 0:
        return x

    flat = x.reshape(-1)
    cols = _choose_cols(n)
    padded = False
    if cols is None:
        # Element count not a multiple of 128: pad minimally once to a
        # lane-dense slab (rare fallback path).
        pad = (-n) % 128
        flat = jnp.pad(flat, (0, pad))
        cols = _choose_cols(flat.size)
        padded = True

    rows = flat.size // cols
    out2 = _gelu_2d(flat.reshape(rows, cols))

    out = out2.reshape(-1)
    if padded:
        out = out[:n]
    return out.reshape(orig_shape)


def _ref_gelu(x):
    xf = x.astype(jnp.float32)
    return (xf * 0.5 * (1.0 + jax.lax.erf(xf / jnp.sqrt(2.0)))).astype(x.dtype)


if __name__ == "__main__":
    key = jax.random.PRNGKey(0)

    # MHSA-style activation shape: (batch, seq, hidden).
    x = jax.random.normal(key, (2, 8, 32), dtype=jnp.float32)
    y = jax.block_until_ready(gelu(x))
    assert y.shape == x.shape and y.dtype == x.dtype
    assert jnp.allclose(y, _ref_gelu(x), atol=1e-6, rtol=1e-6)

    # Odd (non-multiple-of-128) element count exercises the padded fallback.
    x_odd = jax.random.normal(jax.random.PRNGKey(1), (3, 7, 5), dtype=jnp.float32)
    y_odd = jax.block_until_ready(gelu(x_odd))
    assert y_odd.shape == x_odd.shape
    assert jnp.allclose(y_odd, _ref_gelu(x_odd), atol=1e-6, rtol=1e-6)

    # Larger lane-dense slab exercises the tiled (multi-grid-step) path.
    x_big = jax.random.normal(jax.random.PRNGKey(2), (8, 128, 1024), dtype=jnp.bfloat16)
    y_big = jax.block_until_ready(gelu(x_big))
    assert y_big.shape == x_big.shape and y_big.dtype == x_big.dtype
    assert jnp.allclose(
        y_big.astype(jnp.float32), _ref_gelu(x_big).astype(jnp.float32),
        atol=2e-2, rtol=2e-2)

    print("KERNEL_OK")
</pallas_src>

<mosaic_0001>
module attributes {stable_mosaic.version = 11 : i64} {
  func.func @_gelu_kernel(%arg0: i32, %arg1: memref<1x512xf32, #tpu.memory_space<vmem>>, %arg2: memref<1x512xf32, #tpu.memory_space<vmem>>) attributes {dimension_semantics = [#tpu.dimension_semantics<parallel>], iteration_bounds = array<i64: 1>, scalar_prefetch = 0 : i64, scratch_operands = 0 : i64, tpu.core_type = #tpu.core_type<tc>, window_params = [{transform_indices = @transform_0, window_bounds = array<i64: 1, 512>}, {transform_indices = @transform_1, window_bounds = array<i64: 1, 512>}]} {
    %c0 = arith.constant 0 : index
    %c0_0 = arith.constant 0 : index
    %0 = vector.load %arg1[%c0, %c0_0] : memref<1x512xf32, #tpu.memory_space<vmem>>, vector<1x512xf32>
    %cst = arith.constant 0.707106769 : f32
    %1 = vector.broadcast %cst : f32 to vector<1x512xf32>
    %2 = arith.mulf %0, %1 : vector<1x512xf32>
    %3 = math.erf %2 : vector<1x512xf32>
    %cst_1 = arith.constant 1.000000e+00 : f32
    %4 = vector.broadcast %cst_1 : f32 to vector<1x512xf32>
    %5 = arith.addf %4, %3 : vector<1x512xf32>
    %cst_2 = arith.constant 5.000000e-01 : f32
    %6 = vector.broadcast %cst_2 : f32 to vector<1x512xf32>
    %7 = arith.mulf %6, %5 : vector<1x512xf32>
    %8 = arith.mulf %7, %0 : vector<1x512xf32>
    %c0_3 = arith.constant 0 : index
    %c0_4 = arith.constant 0 : index
    %9 = vector.load %arg2[%c0_3, %c0_4] : memref<1x512xf32, #tpu.memory_space<vmem>>, vector<1x512xf32>
    tpu.vector_store %arg2[%c0_3, %c0_4], %8 {strides = array<i32>} : memref<1x512xf32, #tpu.memory_space<vmem>>, vector<1x512xf32>,
    return
  }
  func.func @transform_0(%arg0: i32) -> (i32, i32) {
    %c0_i32 = arith.constant 0 : i32
    %c0_i32_0 = arith.constant 0 : i32
    return %arg0, %c0_i32 : i32, i32
  }
  func.func @transform_1(%arg0: i32) -> (i32, i32) {
    %c0_i32 = arith.constant 0 : i32
    %c0_i32_0 = arith.constant 0 : i32
    return %arg0, %c0_i32 : i32, i32
  }
}

</mosaic_0001>

<bundles_post_ra>
// kernel: tpu_custom_call.1
= control target key start
LH: loop header
LB: loop body
LE: loop exit
PB: predicated region body
PF: predicated region fallthrough
CT: control target
= control target key end

     0   :  { %6 = vsyncpa [#allocation3], 0  ;;  %s113_s0 = inlined_call_operand.hbm [shape: f32[1,512], index: 0, kind: input, shape index: {}]   ;;  %s114_s1 = inlined_call_operand.hbm [shape: f32[1,512], index: 1, kind: output, shape index: {}]  }
   0x1   :  { %7 = vsyncpa [#allocation4], 0  ;;  %s95_s6 = smov [#allocation2]  }
   0x2   :  { %s14_s7 = sshll.u32 %s95_s6, 4  ;;  %s15_s7 = int_to_ptr.vmem [resolvable:$true] %s14_s7 }
   0x3   :  { %s59_s8 = scalar_lea.vmem %s15_s7, 64  ;;  %p64_p1 = scmp.lt.s32.totalorder %s15_s7, %s15_s7 }
   0x4   :  { %p60_p0 = scmp.ne.s32.totalorder %s15_s7, %s59_s8  ;;  %p65_p2 = scmp.lt.s32.totalorder %s59_s8, %s59_s8 }
   0x6   :  { %p66_p3 = por %p65_p2, %p64_p1 }
   0x8   :  { %p67_p4 = pnand %p66_p3, %p60_p0 }
   0xa   :  { %70 = shalt.err (!%p67_p4)
}
   0xb   :  { %17 = dma.hbm_to_vmem [thread:$0]  %s113_s0, 64, %s15_s7, [#allocation3]  }
   0xc   :  { %91 = dma.done.wait [#allocation3], 64  }
   0xd   :  { %92 = vsyncadd [#allocation3], 4294967232  ;;  %v21_v0 = vld [vmem:[#allocation2] sm:$0xf]  ;;  %v27_v3 = vlaneseq  ;;  %s96_s11 = smov [#allocation5]  }
   0xe   :  { %v22_v1 = vmul.f32 0.70710677, %v21_v0  ;;  %s38_s12 = sshll.u32 %s96_s11, 4  ;;  %s39_s12 = int_to_ptr.vmem [resolvable:$true] %s38_s12 }
   0xf   :  { %vm29_vm0 = vcmp.lt.s32.totalorder %v27_v3, 512  ;;  %s71_s13 = scalar_lea.vmem %s39_s12, 64  ;;  %p76_p6 = scmp.lt.s32.totalorder %s39_s12, %s39_s12 }
  0x10   :  { %49 = verf.f32 %v22_v1  ;;  %p72_p5 = scmp.ne.s32.totalorder %s39_s12, %s71_s13  ;;  %p77_p7 = scmp.lt.s32.totalorder %s71_s13, %s71_s13 }
  0x12   :  { %p78_p8 = por %p77_p7, %p76_p6 }
  0x14   :  { %p79_p9 = pnand %p78_p8, %p72_p5 }
  0x1d   :  { %v50_v2 = vpop.eup %49 }
  0x1e   :  { %v24_v4 = vadd.f32 1.0, %v50_v2 }
  0x20   :  { %v25_v5 = vmul.f32 0.5, %v24_v4 }
  0x22   :  { %v26_v6 = vmul.f32 %v25_v5, %v21_v0 }
  0x24   :  { %31 = vst.msk [vmem:[#allocation5] sm:$0xf] %vm29_vm0, %v26_v6 }
  0x25   :  { %82 = shalt.err (!%p79_p9)
}
  0x26   :  { %41 = dma.vmem_to_hbm [thread:$0]  %s39_s12, 64, %s114_s1, [#allocation4]  }
  0x27   :  { %93 = dma.done.wait [#allocation4], 64  }
  0x28   :  { %94 = vsyncadd [#allocation4], 4294967232 }
  0x29   :  { %45 = vsyncpa [#allocation3], 1 }
  0x2a   :  { %46 = vsyncpa [#allocation4], 1 }

</bundles_post_ra>
